<compile_context>
chip_gen: v5e
topology: v5e:2x2
jax: 0.10.0
libtpu: 0.0.40
codegen_flags: <defaults>
</compile_context>

<pallas_src>
import jax
import jax.numpy as jnp
from jax.experimental import pallas as pl
from jax.experimental.pallas import tpu as pltpu


def _round_up(a, m):
    return (a + m - 1) // m * m


def _cdiv(a, b):
    return (a + b - 1) // b


def _vmem_budgets():
    """Generation-aware (vmem_limit_bytes, resident_budget) in bytes."""
    cap = None
    try:
        cap = getattr(pltpu.get_tpu_info(), "vmem_capacity_bytes", None)
    except Exception:
        cap = None
    if not cap:
        cap = 64 * 1024 * 1024                 # conservative fallback (v7x per-core VMEM)
    cap = int(cap)
    vmem_limit = min(int(cap * 0.78), cap - 8 * 1024 * 1024)   # ~100 MiB v5e/v6e, ~50 MiB v7x
    resident_budget = int(cap * 0.625)                         # ~80 MiB v5e/v6e, ~40 MiB v7x
    return vmem_limit, resident_budget


def _pick_tile(HW, max_chunks, cap_chunks=None):
    """HW tile: full extent (waives the 128 rule, no mask) or a 128-multiple tile."""
    n128 = _cdiv(HW, 128)
    c = max(1, max_chunks)
    if cap_chunks is not None:
        c = max(1, min(c, cap_chunks))
    if c >= n128:
        return HW, 1, False
    T = c * 128
    return T, _cdiv(HW, T), (HW % T) != 0


# ---------------------------------------------------------------------------
# Kernels
# ---------------------------------------------------------------------------
def _make_fused_kernel(HW, T, n_hw, ragged):
    """Streamed single pass: pool x/x2 tiles -> fused linear -> sigmoid -> relu(g*scale)."""

    def kernel(g_ref, x_ref, x2_ref, w_ref, b_ref, out_ref, acc_ref):
        t = pl.program_id(1)

        @pl.when(t == 0)
        def _():
            acc_ref[...] = jnp.zeros_like(acc_ref)

        xv = x_ref[...]                                     # (C, T), input dtype
        x2v = x2_ref[...]
        if ragged:                                          # trace-time flag
            lane = jax.lax.broadcasted_iota(jnp.int32, xv.shape, 1) + t * T
            keep = lane < HW
            zero = jnp.zeros((), xv.dtype)
            xv = jnp.where(keep, xv, zero)
            x2v = jnp.where(keep, x2v, zero)
        acc_ref[0] += jnp.sum(xv, axis=1, keepdims=True, dtype=jnp.float32)
        acc_ref[1] += jnp.sum(x2v, axis=1, keepdims=True, dtype=jnp.float32)

        @pl.when(t == n_hw - 1)
        def _():
            # g is a full, exact (C, HW) resident block -> no masking needed.
            sg = jnp.sum(g_ref[...], axis=1, keepdims=True, dtype=jnp.float32)
            att = (jnp.dot(w_ref[0], acc_ref[0], preferred_element_type=jnp.float32)
                   + jnp.dot(w_ref[1], acc_ref[1], preferred_element_type=jnp.float32)
                   + jnp.dot(w_ref[2], sg, preferred_element_type=jnp.float32)
                   + b_ref[...])                            # (C, 1)
            scale = jax.nn.sigmoid(att).astype(out_ref.dtype)
            out_ref[...] = jnp.maximum(g_ref[...] * scale,
                                       jnp.zeros((), out_ref.dtype))

    return kernel


def _make_pool_kernel(HW, T, ragged):
    """Two-pass, pass 1: accumulate pooled sums for (x, x2, g) over HW tiles."""

    def kernel(g_ref, x_ref, x2_ref, sums_ref):
        t = pl.program_id(1)

        @pl.when(t == 0)
        def _():
            sums_ref[...] = jnp.zeros_like(sums_ref)

        gv = g_ref[...]
        xv = x_ref[...]
        x2v = x2_ref[...]
        if ragged:
            lane = jax.lax.broadcasted_iota(jnp.int32, xv.shape, 1) + t * T
            keep = lane < HW
            zero = jnp.zeros((), xv.dtype)
            gv = jnp.where(keep, gv, zero)
            xv = jnp.where(keep, xv, zero)
            x2v = jnp.where(keep, x2v, zero)
        sums_ref[0] += jnp.sum(xv, axis=1, keepdims=True, dtype=jnp.float32)
        sums_ref[1] += jnp.sum(x2v, axis=1, keepdims=True, dtype=jnp.float32)
        sums_ref[2] += jnp.sum(gv, axis=1, keepdims=True, dtype=jnp.float32)

    return kernel


def _apply_kernel(g_ref, scale_ref, out_ref):
    """Two-pass, pass 2: out = relu(g * scale); fully parallel over (B, HW-tile)."""
    s = scale_ref[...]                                      # (C, 1), input dtype
    out_ref[...] = jnp.maximum(g_ref[...] * s, jnp.zeros((), out_ref.dtype))


# ---------------------------------------------------------------------------
# Wrapper
# ---------------------------------------------------------------------------
def _fuse_params(params, HW):
    """Stack the three linears into one operand; fold avg-pool and /3 into it."""
    w_stk = jnp.stack([params["wx"], params["wx2"], params["wg"]], axis=0)
    w_stk = w_stk.astype(jnp.float32) * (1.0 / (3.0 * HW))            # (3, C, C)
    b_cat = ((params["bx"] + params["bx2"] + params["bg"]) / 3.0).astype(jnp.float32)
    return w_stk, b_cat                                               # (C, 1)


def cca_threefeature(g, x, x2, params, *, path=None, max_tile_chunks=None):
    """g: (B, F_g, H, W), x: (B, F_x, H, W), x2: (B, F_x, H, W).

    path: None (auto) | "fused" | "two_pass".  max_tile_chunks is a debug knob
    capping the HW tile width (in 128-lane chunks).
    """
    B, Fg, H, W = g.shape
    _, Fx, Hx, Wx = x.shape
    _, Fx2, Hx2, Wx2 = x2.shape
    assert Fx2 == Fx
    # PyTorch's `g * scale.expand_as(x)` broadcast requires matching shapes.
    assert Fg == Fx and (H, W) == (Hx, Wx) == (Hx2, Wx2)

    C = Fx
    HW = H * W
    dtype = g.dtype
    itemsize = jnp.dtype(dtype).itemsize
    sub = max(8, 32 // max(1, itemsize))
    Cr = _round_up(C, sub)                 # layout-padded channel count (estimates only)
    HWr = _round_up(HW, 128)

    vmem_limit, budget = _vmem_budgets()

    # Free reshapes only: no padded HBM copies, no output slice.
    g_f = g.reshape(B, C, HW)
    x_f = x.reshape(B, C, HW)
    x2_f = x2.reshape(B, C, HW)

    chunk = Cr * 128 * itemsize                                   # one 128-lane strip
    w_bytes = 4 * (3 * Cr * Cr + Cr * 128)                        # single-buffered f32 weights
    fused_fixed = 4 * Cr * HWr * itemsize + w_bytes               # g + out, double-buffered
    fused_left = budget - fused_fixed
    # In-kernel f32 matvec operands are kept on the proven 8-aligned sublane path.
    fused_ok = (fused_left >= 4 * chunk) and (C % 8 == 0)

    if path == "fused":
        use_fused = True
    elif path == "two_pass":
        use_fused = False
    else:
        use_fused = fused_ok

    if use_fused:
        T, n_hw, ragged = _pick_tile(HW, fused_left // (4 * chunk), max_tile_chunks)
        w_stk, b_cat = _fuse_params(params, HW)
        out_f = pl.pallas_call(
            _make_fused_kernel(HW, T, n_hw, ragged),
            out_shape=jax.ShapeDtypeStruct((B, C, HW), dtype),
            grid_spec=pltpu.PrefetchScalarGridSpec(
                num_scalar_prefetch=0,
                grid=(B, n_hw),
                in_specs=[
                    pl.BlockSpec((None, C, HW), lambda b, t: (b, 0, 0)),   # g: batch-resident
                    pl.BlockSpec((None, C, T), lambda b, t: (b, 0, t)),    # x: streamed
                    pl.BlockSpec((None, C, T), lambda b, t: (b, 0, t)),    # x2: streamed
                    pl.BlockSpec((3, C, C), lambda b, t: (0, 0, 0),
                                 pipeline_mode=pl.Buffered(1)),            # weights: fetched once
                    pl.BlockSpec((C, 1), lambda b, t: (0, 0),
                                 pipeline_mode=pl.Buffered(1)),            # bias: fetched once
                ],
                out_specs=pl.BlockSpec((None, C, HW), lambda b, t: (b, 0, 0)),
                scratch_shapes=[pltpu.VMEM((2, C, 1), jnp.float32)],
            ),
            compiler_params=pltpu.CompilerParams(
                dimension_semantics=("parallel", "arbitrary"),
                vmem_limit_bytes=vmem_limit),
            cost_estimate=pl.CostEstimate(
                flops=B * (4 * C * HW + 6 * C * C),
                transcendentals=B * C,
                bytes_accessed=4 * B * C * HW * itemsize + 4 * (3 * C * C + C)),
        )(g_f, x_f, x2_f, w_stk, b_cat)
        return out_f.reshape(B, C, H, W)

    # ---------------- two-pass path ----------------
    # Pass 1: pooled sums per batch; the (3,C,C) weight never enters VMEM.
    T1, n1, ragged1 = _pick_tile(HW, budget // (6 * chunk), max_tile_chunks)
    sums = pl.pallas_call(
        _make_pool_kernel(HW, T1, ragged1),
        out_shape=jax.ShapeDtypeStruct((B, 3, C, 1), jnp.float32),
        grid_spec=pltpu.PrefetchScalarGridSpec(
            num_scalar_prefetch=0,
            grid=(B, n1),
            in_specs=[
                pl.BlockSpec((None, C, T1), lambda b, t: (b, 0, t)),   # g
                pl.BlockSpec((None, C, T1), lambda b, t: (b, 0, t)),   # x
                pl.BlockSpec((None, C, T1), lambda b, t: (b, 0, t)),   # x2
            ],
            out_specs=pl.BlockSpec((None, 3, C, 1), lambda b, t: (b, 0, 0, 0)),
        ),
        compiler_params=pltpu.CompilerParams(
            dimension_semantics=("parallel", "arbitrary"),
            vmem_limit_bytes=vmem_limit),
        cost_estimate=pl.CostEstimate(
            flops=3 * B * C * HW,
            transcendentals=0,
            bytes_accessed=3 * B * C * HW * itemsize + 12 * B * C),
    )(g_f, x_f, x2_f)

    # Tiny (B,C)x(C,C) matvecs + sigmoid in plain JAX (keeps weights out of VMEM).
    sx, sx2, sg = sums[:, 0, :, 0], sums[:, 1, :, 0], sums[:, 2, :, 0]     # (B, C)
    wx = params["wx"].astype(jnp.float32)
    wx2 = params["wx2"].astype(jnp.float32)
    wg = params["wg"].astype(jnp.float32)
    bsum = (params["bx"] + params["bx2"] + params["bg"]).astype(jnp.float32)[:, 0]
    att = (sx @ wx.T + sx2 @ wx2.T + sg @ wg.T) / (3.0 * HW) + bsum / 3.0
    scale = jax.nn.sigmoid(att).astype(dtype)[:, :, None]                  # (B, C, 1)

    # Pass 2: elementwise g*scale + ReLU, both grid axes parallel (megacore).
    T2, n2, _ = _pick_tile(HW, budget // (4 * chunk), max_tile_chunks)
    out_f = pl.pallas_call(
        _apply_kernel,
        out_shape=jax.ShapeDtypeStruct((B, C, HW), dtype),
        grid_spec=pltpu.PrefetchScalarGridSpec(
            num_scalar_prefetch=0,
            grid=(B, n2),
            in_specs=[
                pl.BlockSpec((None, C, T2), lambda b, t: (b, 0, t)),   # g
                pl.BlockSpec((None, C, 1), lambda b, t: (b, 0, 0)),    # scale
            ],
            out_specs=pl.BlockSpec((None, C, T2), lambda b, t: (b, 0, t)),
        ),
        compiler_params=pltpu.CompilerParams(
            dimension_semantics=("parallel", "parallel"),
            vmem_limit_bytes=vmem_limit),
        cost_estimate=pl.CostEstimate(
            flops=2 * B * C * HW,
            transcendentals=0,
            bytes_accessed=2 * B * C * HW * itemsize + B * C * itemsize),
    )(g_f, scale)
    return out_f.reshape(B, C, H, W)


# ---------------------------------------------------------------------------
# Params / reference / test
# ---------------------------------------------------------------------------
def init_params(key, F_g, F_x, dtype=jnp.float32):
    """Deterministic synthetic init matching nn.Linear shapes (out, in)."""
    ks = jax.random.split(key, 6)

    def lin(kw, kb, fan_in, fan_out):
        bound = 1.0 / jnp.sqrt(fan_in)
        w = jax.random.uniform(kw, (fan_out, fan_in), dtype, -bound, bound)
        b = jax.random.uniform(kb, (fan_out, 1), dtype, -bound, bound)
        return w, b

    wx, bx = lin(ks[0], ks[1], F_x, F_x)
    wx2, bx2 = lin(ks[2], ks[3], F_x, F_x)
    wg, bg = lin(ks[4], ks[5], F_g, F_x)
    return {"wx": wx, "bx": bx, "wx2": wx2, "bx2": bx2, "wg": wg, "bg": bg}


def reference(g, x, x2, params):
    """Pure-JAX reference mirroring the PyTorch forward (unfused weights)."""
    def pool(t):
        return jnp.mean(t, axis=(2, 3))                     # (B, C)

    att_x = pool(x) @ params["wx"].T + params["bx"][:, 0]
    att_x2 = pool(x2) @ params["wx2"].T + params["bx2"][:, 0]
    att_g = pool(g) @ params["wg"].T + params["bg"][:, 0]
    scale = jax.nn.sigmoid((att_x + att_g + att_x2) / 3.0)  # (B, F_x)
    out = g * scale[:, :, None, None]
    return jnp.maximum(out, 0.0)


if __name__ == "__main__":
    key = jax.random.PRNGKey(0)

    def run_case(B, C, H, W, seed, **kw):
        k = jax.random.fold_in(key, seed)
        kg, kx, kx2, kp = jax.random.split(k, 4)
        g = jax.random.normal(kg, (B, C, H, W), jnp.float32)
        x = jax.random.normal(kx, (B, C, H, W), jnp.float32)
        x2 = jax.random.normal(kx2, (B, C, H, W), jnp.float32)
        params = init_params(kp, C, C)
        out = jax.block_until_ready(cca_threefeature(g, x, x2, params, **kw))
        ref = reference(g, x, x2, params)
        assert out.shape == g.shape
        assert jnp.allclose(out, ref, atol=2e-5, rtol=2e-5), f"mismatch for {kw}"

    # Case 1 (spec shape): B=2, C=4, 16x16 -> auto path (two-pass; C not 8-aligned).
    run_case(2, 4, 16, 16, 0)
    # Case 2: aligned C=16 -> auto fused single pass; cross-check forced two-pass.
    run_case(2, 16, 16, 16, 1)
    run_case(2, 16, 16, 16, 1, path="two_pass")
    # Case 3: odd C and odd H*W (5 ch, 9x9): unpadded full-extent blocks, no HBM pads.
    run_case(2, 5, 9, 9, 2)
    # Case 4: ragged HW=300 streamed in 128-lane tiles (in-kernel tail masking),
    # exercised on both the streamed-fused and the two-pass path.
    run_case(2, 8, 15, 20, 3, path="fused", max_tile_chunks=1)
    run_case(2, 8, 15, 20, 3, path="two_pass", max_tile_chunks=1)

    print("KERNEL_OK")
</pallas_src>

<mosaic_0001>
module attributes {stable_mosaic.version = 11 : i64} {
  func.func @kernel(%arg0: i32, %arg1: i32, %arg2: memref<1x4x256xf32, #tpu.memory_space<vmem>>, %arg3: memref<1x4x256xf32, #tpu.memory_space<vmem>>, %arg4: memref<1x4x256xf32, #tpu.memory_space<vmem>>, %arg5: memref<1x3x4x1xf32, #tpu.memory_space<vmem>>) attributes {dimension_semantics = [#tpu.dimension_semantics<parallel>, #tpu.dimension_semantics<arbitrary>], iteration_bounds = array<i64: 2, 1>, scalar_prefetch = 0 : i64, scratch_operands = 0 : i64, tpu.core_type = #tpu.core_type<tc>, window_params = [{transform_indices = @transform_0, window_bounds = array<i64: 1, 4, 256>}, {transform_indices = @transform_1, window_bounds = array<i64: 1, 4, 256>}, {transform_indices = @transform_2, window_bounds = array<i64: 1, 4, 256>}, {transform_indices = @transform_3, window_bounds = array<i64: 1, 3, 4, 1>}]} {
    %c0_i32 = arith.constant 0 : i32
    %0 = arith.cmpi eq, %arg1, %c0_i32 : i32
    %1 = arith.extui %0 : i1 to i32
    %c0_i32_0 = arith.constant 0 : i32
    %2 = arith.cmpi ne, %1, %c0_i32_0 : i32
    scf.if %2 {
      %cst_33 = arith.constant 0.000000e+00 : f32
      %33 = vector.broadcast %cst_33 : f32 to vector<3x4x1xf32>
      %c0_34 = arith.constant 0 : index
      %c0_35 = arith.constant 0 : index
      %c0_36 = arith.constant 0 : index
      %c0_37 = arith.constant 0 : index
      %34 = vector.load %arg5[%c0_34, %c0_35, %c0_36, %c0_37] : memref<1x3x4x1xf32, #tpu.memory_space<vmem>>, vector<1x3x4x1xf32>
      %35 = vector.shape_cast %34 : vector<1x3x4x1xf32> to vector<3x4x1xf32>
      %36 = vector.shape_cast %33 : vector<3x4x1xf32> to vector<1x3x4x1xf32>
      tpu.vector_store %arg5[%c0_34, %c0_35, %c0_36, %c0_37], %36 {strides = array<i32>} : memref<1x3x4x1xf32, #tpu.memory_space<vmem>>, vector<1x3x4x1xf32>,
    } else {
    }
    %c0 = arith.constant 0 : index
    %c0_1 = arith.constant 0 : index
    %c0_2 = arith.constant 0 : index
    %3 = vector.load %arg2[%c0, %c0_1, %c0_2] : memref<1x4x256xf32, #tpu.memory_space<vmem>>, vector<1x4x256xf32>
    %4 = vector.shape_cast %3 : vector<1x4x256xf32> to vector<4x256xf32>
    %c0_3 = arith.constant 0 : index
    %c0_4 = arith.constant 0 : index
    %c0_5 = arith.constant 0 : index
    %5 = vector.load %arg3[%c0_3, %c0_4, %c0_5] : memref<1x4x256xf32, #tpu.memory_space<vmem>>, vector<1x4x256xf32>
    %6 = vector.shape_cast %5 : vector<1x4x256xf32> to vector<4x256xf32>
    %c0_6 = arith.constant 0 : index
    %c0_7 = arith.constant 0 : index
    %c0_8 = arith.constant 0 : index
    %7 = vector.load %arg4[%c0_6, %c0_7, %c0_8] : memref<1x4x256xf32, #tpu.memory_space<vmem>>, vector<1x4x256xf32>
    %8 = vector.shape_cast %7 : vector<1x4x256xf32> to vector<4x256xf32>
    %c0_9 = arith.constant 0 : index
    %c0_10 = arith.constant 0 : index
    %c0_11 = arith.constant 0 : index
    %c0_12 = arith.constant 0 : index
    %9 = vector.load %arg5[%c0_9, %c0_10, %c0_11, %c0_12] : memref<1x3x4x1xf32, #tpu.memory_space<vmem>>, vector<1x1x4x1xf32>
    %10 = vector.shape_cast %9 : vector<1x1x4x1xf32> to vector<4x1xf32>
    %cst = arith.constant dense<0.000000e+00> : vector<4xf32>
    %11 = vector.multi_reduction <add>, %6, %cst [1] : vector<4x256xf32> to vector<4xf32>
    %12 = vector.shape_cast %11 : vector<4xf32> to vector<4x1xf32>
    %13 = arith.addf %10, %12 : vector<4x1xf32>
    %c0_13 = arith.constant 0 : index
    %c0_14 = arith.constant 0 : index
    %c0_15 = arith.constant 0 : index
    %c0_16 = arith.constant 0 : index
    %14 = vector.load %arg5[%c0_13, %c0_14, %c0_15, %c0_16] : memref<1x3x4x1xf32, #tpu.memory_space<vmem>>, vector<1x1x4x1xf32>
    %15 = vector.shape_cast %14 : vector<1x1x4x1xf32> to vector<4x1xf32>
    %16 = vector.shape_cast %13 : vector<4x1xf32> to vector<1x1x4x1xf32>
    tpu.vector_store %arg5[%c0_13, %c0_14, %c0_15, %c0_16], %16 {strides = array<i32>} : memref<1x3x4x1xf32, #tpu.memory_space<vmem>>, vector<1x1x4x1xf32>,
    %c0_17 = arith.constant 0 : index
    %c1 = arith.constant 1 : index
    %c0_18 = arith.constant 0 : index
    %c0_19 = arith.constant 0 : index
    %17 = vector.load %arg5[%c0_17, %c1, %c0_18, %c0_19] : memref<1x3x4x1xf32, #tpu.memory_space<vmem>>, vector<1x1x4x1xf32>
    %18 = vector.shape_cast %17 : vector<1x1x4x1xf32> to vector<4x1xf32>
    %cst_20 = arith.constant dense<0.000000e+00> : vector<4xf32>
    %19 = vector.multi_reduction <add>, %8, %cst_20 [1] : vector<4x256xf32> to vector<4xf32>
    %20 = vector.shape_cast %19 : vector<4xf32> to vector<4x1xf32>
    %21 = arith.addf %18, %20 : vector<4x1xf32>
    %c0_21 = arith.constant 0 : index
    %c1_22 = arith.constant 1 : index
    %c0_23 = arith.constant 0 : index
    %c0_24 = arith.constant 0 : index
    %22 = vector.load %arg5[%c0_21, %c1_22, %c0_23, %c0_24] : memref<1x3x4x1xf32, #tpu.memory_space<vmem>>, vector<1x1x4x1xf32>
    %23 = vector.shape_cast %22 : vector<1x1x4x1xf32> to vector<4x1xf32>
    %24 = vector.shape_cast %21 : vector<4x1xf32> to vector<1x1x4x1xf32>
    tpu.vector_store %arg5[%c0_21, %c1_22, %c0_23, %c0_24], %24 {strides = array<i32>} : memref<1x3x4x1xf32, #tpu.memory_space<vmem>>, vector<1x1x4x1xf32>,
    %c0_25 = arith.constant 0 : index
    %c2 = arith.constant 2 : index
    %c0_26 = arith.constant 0 : index
    %c0_27 = arith.constant 0 : index
    %25 = vector.load %arg5[%c0_25, %c2, %c0_26, %c0_27] : memref<1x3x4x1xf32, #tpu.memory_space<vmem>>, vector<1x1x4x1xf32>
    %26 = vector.shape_cast %25 : vector<1x1x4x1xf32> to vector<4x1xf32>
    %cst_28 = arith.constant dense<0.000000e+00> : vector<4xf32>
    %27 = vector.multi_reduction <add>, %4, %cst_28 [1] : vector<4x256xf32> to vector<4xf32>
    %28 = vector.shape_cast %27 : vector<4xf32> to vector<4x1xf32>
    %29 = arith.addf %26, %28 : vector<4x1xf32>
    %c0_29 = arith.constant 0 : index
    %c2_30 = arith.constant 2 : index
    %c0_31 = arith.constant 0 : index
    %c0_32 = arith.constant 0 : index
    %30 = vector.load %arg5[%c0_29, %c2_30, %c0_31, %c0_32] : memref<1x3x4x1xf32, #tpu.memory_space<vmem>>, vector<1x1x4x1xf32>
    %31 = vector.shape_cast %30 : vector<1x1x4x1xf32> to vector<4x1xf32>
    %32 = vector.shape_cast %29 : vector<4x1xf32> to vector<1x1x4x1xf32>
    tpu.vector_store %arg5[%c0_29, %c2_30, %c0_31, %c0_32], %32 {strides = array<i32>} : memref<1x3x4x1xf32, #tpu.memory_space<vmem>>, vector<1x1x4x1xf32>,
    return
  }
  func.func @transform_0(%arg0: i32, %arg1: i32) -> (i32, i32, i32) {
    %c0_i32 = arith.constant 0 : i32
    %c0_i32_0 = arith.constant 0 : i32
    return %arg0, %c0_i32, %arg1 : i32, i32, i32
  }
  func.func @transform_1(%arg0: i32, %arg1: i32) -> (i32, i32, i32) {
    %c0_i32 = arith.constant 0 : i32
    %c0_i32_0 = arith.constant 0 : i32
    return %arg0, %c0_i32, %arg1 : i32, i32, i32
  }
  func.func @transform_2(%arg0: i32, %arg1: i32) -> (i32, i32, i32) {
    %c0_i32 = arith.constant 0 : i32
    %c0_i32_0 = arith.constant 0 : i32
    return %arg0, %c0_i32, %arg1 : i32, i32, i32
  }
  func.func @transform_3(%arg0: i32, %arg1: i32) -> (i32, i32, i32, i32) {
    %c0_i32 = arith.constant 0 : i32
    %c0_i32_0 = arith.constant 0 : i32
    %c0_i32_1 = arith.constant 0 : i32
    %c0_i32_2 = arith.constant 0 : i32
    return %arg0, %c0_i32, %c0_i32_0, %c0_i32_1 : i32, i32, i32, i32
  }
}

</mosaic_0001>

<bundles_post_ra>
// kernel: tpu_custom_call.1
= control target key start
LH: loop header
LB: loop body
LE: loop exit
PB: predicated region body
PF: predicated region fallthrough
CT: control target
= control target key end

     0   :  { %8 = vsyncpa [#allocation3], 0  ;;  %s881_s0 = inlined_call_operand.hbm [shape: f32[2,4,256], index: 0, kind: input, shape index: {}]   ;;  %s882_s1 = inlined_call_operand.hbm [shape: f32[2,4,256], index: 1, kind: input, shape index: {}]   ;;  %s883_s2 = inlined_call_operand.hbm [shape: f32[2,4,256], index: 2, kind: input, shape index: {}]   ;;  %s884_s3 = inlined_call_operand.vmem [shape: f32[2,3,4,1], index: 3, kind: output, shape index: {}]  }
   0x1   :  { %10 = vsyncpa [#allocation3 + $0x1], 0 }
   0x2   :  { %11 = vsyncpa [#allocation5], 0 }
   0x3   :  { %13 = vsyncpa [#allocation5 + $0x1], 0  ;;  %s740_s12 = smov 0   ;;  %s742_s13 = smov 0  }
   0x4   :  { %s744_s14 = smov 0   ;;  %s746_s15 = smov 0  }
   0x5   :  { %s748_s16 = smov 0   ;;  %s750_s17 = smov 0  }
   0x6 LB: > { %s885_s18 = sadd.s32 4294967295, %s717_s17   ;;  %s31_s19 = sadd.s32 1, %s713_s16  ;;  %s717_s17 = sphi %s750_s17, %s19_s17   ;;  %s713_s16 = sphi %s748_s16, %s894_s16   ;;  %s709_s15 = sphi %s746_s15, %s893_s15   ;;  %s705_s14 = sphi %s744_s14, %s892_s14   ;;  %s701_s13 = sphi %s742_s13, %s891_s13   ;;  %s697_s12 = sphi %s740_s12, %s890_s12  }
   0x7   : > { %p33_p0 = scmp.ge.s32.totalorder %s31_s19, 2  ;;  %s40_s20 = sadd.s32 1, %s705_s14 }
   0x8   : > { %p47_p1 = scmp.ne.s32.totalorder %s705_s14, %s701_s13  ;;  %p48_p2 = scmp.eq.s32.totalorder %s717_s17, 0 }
   0x9   : > { %s896_s19 = smov (%p33_p0, %s31_s19), 0  ;;  %p53_p4 = scmp.ne.s32.totalorder %s701_s13, %s697_s12 }
   0xa   : > { %p49_p3 = por %p48_p2, %p47_p1  ;;  %s35_s21 = ssub.s32 %s713_s16, %s896_s19 }
   0xb   : > { %p54_p5 = scmp.eq.s32.totalorder %s885_s18, 0  ;;  %p38_p6 = scmp.eq.s32.totalorder %s35_s21, 0 }
   0xc   : > { %p523_p8 = scmp.lt.s32.totalorder %s717_s17, 2  ;;  %s159_s24 = sand.u32 1, %s705_s14  }
   0xd   : > { %p781_p7 = por %p54_p5, %p53_p4  ;;  %s503_s25 = sshll.u32 %s713_s16, 3 }
   0xe   : > { %s787_s23 = scalar_select %p38_p6, %s705_s14, %s40_s20  }
   0xf   : > { %s483_s26 = sshll.u32 %s159_s24, 3  ;;  %p791_p9 = pnand %p523_p8, %p49_p3 }
  0x10   : > { %s181_s28 = sand.u32 1, %s717_s17   ;;  %s192_s4 = scalar_lea.hbm %s882_s1, %s503_s25 }
  0x11   : > { %s185_s5 = scalar_lea.vmem [#allocation4], %s483_s26  ;;  %s194_s7 = sshll.u32 %s192_s4, 4  ;;  %s195_s7 = int_to_ptr.hbm [resolvable:$true] %s194_s7 }
  0x12   : > { %s196_s6 = sshll.u32 %s185_s5, 4  ;;  %p492_p10 = scmp.ge.s32.totalorder %s717_s17, 1  ;;  %s197_s6 = int_to_ptr.vmem [resolvable:$true] %s196_s6 }
  0x13   : > { %s182_s8 = scalar_lea.sflag [#allocation5], %s181_s28  ;;  %p223_p11 = scmp.lt.s32.totalorder %s717_s17, 3 }
  0x14   : > { %519 = dma.hbm_to_vmem [thread:$0]  (!%p791_p9), %s195_s7, 128, %s197_s6, %s182_s8  }
  0x15   : > { %p803_p12 = pnand %p492_p10, %p223_p11  ;;  %s170_s12 = scalar_lea.hbm %s881_s0, %s503_s25 }
  0x16   : > { %s163_s20 = scalar_lea.vmem [#allocation2], %s483_s26  ;;  %s172_s29 = sshll.u32 %s170_s12, 4  ;;  %s173_s29 = int_to_ptr.hbm [resolvable:$true] %s172_s29 }
  0x17   : > { %s174_s21 = sshll.u32 %s163_s20, 4  ;;  %s160_s30 = scalar_lea.sflag [#allocation3], %s159_s24  ;;  %s175_s21 = int_to_ptr.vmem [resolvable:$true] %s174_s21 }
  0x18   : > { %516 = dma.hbm_to_vmem [thread:$0]  (!%p791_p9), %s173_s29, 128, %s175_s21, %s160_s30  }
  0x19   : > { %s214_s5 = scalar_lea.hbm %s883_s2, %s503_s25  ;;  %s207_s6 = scalar_lea.vmem [#allocation6], %s483_s26 }
  0x1a   : > { %s218_s7 = sshll.u32 %s207_s6, 4  ;;  %s216_s18 = sshll.u32 %s214_s5, 4  ;;  %s219_s7 = int_to_ptr.vmem [resolvable:$true] %s218_s7  ;;  %s217_s18 = int_to_ptr.hbm [resolvable:$true] %s216_s18 }
  0x1b   : > { %522 = dma.hbm_to_vmem [thread:$0]  (!%p791_p9), %s217_s18, 128, %s219_s7, %s182_s8  }
  0x1c   : > { %227 = sbr.rel (%p803_p12) target bundleno = 186 (0xba), region = 32  ;;  %s229_s10 = sand.u32 (!%p803_p12), 1, %s701_s13  }
  0x1d   : > { %s820_s24 = sshll.u32 (!%p803_p12), %s229_s10, 3  ;;  %s230_s11 = scalar_lea.sflag (!%p803_p12), [#allocation3], %s229_s10 }
  0x1e   : > { %s233_s12 = scalar_lea.vmem (!%p803_p12), [#allocation2], %s820_s24 }
  0x21   : > { %688 = dma.done.wait (%p781_p7), %s230_s11, 128  }
  0x22   : > { %690 = vsyncadd (%p781_p7), %s230_s11, 4294967168  ;;  %s889_s25 = sadd.s32 4294967295, %s717_s17   ;;  %s243_s27 = scalar_lea.vmem [#allocation4], %s820_s24 }
  0x23   : > { %s239_s18 = sand.u32 1, %s889_s25  }
  0x24   : > { %s240_s26 = scalar_lea.sflag [#allocation5], %s239_s18 }
  0x25   : > { %692 = dma.done.wait (%p781_p7), %s240_s26, 256  }
  0x26   : > { %694 = vsyncadd (%p781_p7), %s240_s26, 4294967040  ;;  %p290_p13 = scmp.lt.s32.totalorder %s709_s15, 1  ;;  %vm299_vm0 = vcmask 3072   ;;  %v304_v0 = vld [vmem:[%s243_s27] sm:$0xff]  ;;  %v719_v1 = vmov 0.0   ;;  %s253_s22 = scalar_lea.vmem [#allocation6], %s820_s24 }
  0x27   : > { %308 = vst [vmem:[#allocation1] ss:$2 sm:$0xff] %v304_v0  ;;  %v305_v2 = vld [vmem:[%s253_s22] sm:$0xff]  ;;  %vm313_vm1 = vcmask 1043456  }
  0x28   : > { %s898_s15 = smov (!%p290_p13, %s709_s15), 1  ;;  %v303_v8 = vld [vmem:[%s233_s12] sm:$0xff] }
  0x29   : > { %s506_s8 = smul.u32 12, %s898_s15 }
  0x2b   : > { %s839_s21 = scalar_lea.vmem %s884_s3, %s506_s8 }
  0x2c   : > { %300 = vst.msk [vmem:[%s839_s21] sm:$0xf] %vm299_vm0, %v719_v1 }
  0x2d   : > { %301 = vst.msk [vmem:[%s839_s21 + $0x4] sm:$0xf] %vm299_vm0, %v719_v1 }
  0x2e   : > { %302 = vst.msk [vmem:[%s839_s21 + $0x8] sm:$0xf] %vm299_vm0, %v719_v1  ;;  %v309_v3 = vld.sshfl [vmem:[#allocation1] sm:$0xff pattern:$0x75316420] }
  0x2f   : > { %v310_v4 = vld.sshfl [vmem:[#allocation1 + $0x8] sm:$0xff pattern:$0x75316420]  ;;  %v314_v5 = vsel %vm313_vm1, %v309_v3, 0.0 }
  0x30   : > { %v315_v6 = vsel %vm313_vm1, %v310_v4, 0.0  ;;  %325 = vst [vmem:[#allocation1] ss:$2 sm:$0xff] %v305_v2 }
  0x31   : > { %v316_v7 = vadd.f32 %v315_v6, %v314_v5 }
  0x33   : > { %317 = vadd.xlane.f32.xlu0 %v316_v7  ;;  %v306_v19 = vld [vmem:[%s839_s21] sm:$0xf] }
  0x34   : > { %v497_v22 = vld [vmem:[%s839_s21 + $0x4] sm:$0xf] }
  0x35   : > { %v499_v25 = vld [vmem:[%s839_s21 + $0x8] sm:$0xf] }
  0x37   : > { %v326_v9 = vld.sshfl [vmem:[#allocation1] sm:$0xff pattern:$0x75316420]  ;;  %v327_v10 = vld.sshfl [vmem:[#allocation1 + $0x8] sm:$0xff pattern:$0x75316420] }
  0x38   : > { %v330_v11 = vsel %vm313_vm1, %v326_v9, 0.0  ;;  %v331_v12 = vsel %vm313_vm1, %v327_v10, 0.0  ;;  %340 = vst [vmem:[#allocation1] ss:$2 sm:$0xff] %v303_v8 }
  0x39   : > { %v332_v13 = vadd.f32 %v331_v12, %v330_v11 }
  0x3b   : > { %333 = vadd.xlane.f32.xlu0 %v332_v13 }
  0x3f   : > { %v341_v14 = vld.sshfl [vmem:[#allocation1] sm:$0xff pattern:$0x75316420]  ;;  %v342_v15 = vld.sshfl [vmem:[#allocation1 + $0x8] sm:$0xff pattern:$0x75316420] }
  0x40   : > { %v345_v16 = vsel %vm313_vm1, %v341_v14, 0.0  ;;  %v346_v17 = vsel %vm313_vm1, %v342_v15, 0.0 }
  0x41   : > { %v347_v18 = vadd.f32 %v346_v17, %v345_v16 }
  0x43   : > { %348 = vadd.xlane.f32.xlu1 %v347_v18 }
  0xa6   : > { %v318_v20 = vpop.xlane.xlu0 %317 }
  0xa7   : > { %v319_v21 = vadd.f32 %v318_v20, %v306_v19 }
  0xa9   : > { %321 = vst.msk [vmem:[%s839_s21] sm:$0xf] %vm299_vm0, %v319_v21 }
  0xae   : > { %v334_v23 = vpop.xlane.xlu0 %333 }
  0xaf   : > { %v335_v24 = vadd.f32 %v497_v22, %v334_v23 }
  0xb1   : > { %498 = vst.msk [vmem:[%s839_s21 + $0x4] sm:$0xf] %vm299_vm0, %v335_v24 }
  0xb6   : > { %v349_v26 = vpop.xlane.xlu1 %348 }
  0xb7   : > { %v350_v27 = vadd.f32 %v499_v25, %v349_v26 }
  0xb9   : > { %500 = vst.msk [vmem:[%s839_s21 + $0x8] sm:$0xf] %vm299_vm0, %v350_v27 }
  0xba PF: > { %s19_s17 = sadd.s32 1, %s717_s17   ;;  %s890_s12 = smov %s701_s13 }
  0xbb   : > { %p16_p0 = scmp.ge.s32.totalorder %s19_s17, 4   ;;  %s891_s13 = smov %s705_s14 }
  0xbc   : > { %s892_s14 = smov %s787_s23  ;;  %s893_s15 = smov %s713_s16 }
  0xbd   : > { %s894_s16 = smov %s896_s19  ;;  %18 = sbr.rel (!%p16_p0) target bundleno = 6 (0x6), region = 102 }
  0xc2   :  { %373 = vsyncpa [#allocation3], 1 }
  0xc3   :  { %375 = vsyncpa [#allocation3 + $0x1], 1 }
  0xc4   :  { %376 = vsyncpa [#allocation5], 1 }
  0xc5   :  { %378 = vsyncpa [#allocation5 + $0x1], 1 }

</bundles_post_ra>
